<compile_context>
chip_gen: v5e
topology: v5e:2x2
jax: 0.10.0
libtpu: 0.0.40
codegen_flags: <defaults>
</compile_context>

<pallas_src>
import jax
import jax.numpy as jnp
from jax.experimental import pallas as pl
from jax.experimental.pallas import tpu as pltpu


def _drop_path_kernel(scale_ref, x_ref, o_ref):
    # scale_ref: (bt, 1, 1) float32, one entry per batch element of this block
    # (either 0.0 or 1/keep_prob).  Multiply in the input's native dtype; the
    # kernel is memory-bound so no f32 upcast is needed.
    scale = scale_ref[...].astype(x_ref.dtype)
    o_ref[...] = (x_ref[...] * scale).astype(o_ref.dtype)


def _vmem_budget():
    """Per-generation (block_bytes_cap, vmem_limit_bytes)."""
    kind = ""
    try:
        kind = jax.devices()[0].device_kind.lower()
    except Exception:
        pass
    if "v5e" in kind or "v5 lite" in kind or "v5lite" in kind:
        return 4 << 20, 32 << 20          # v5e: small scoped-VMEM default
    if "v7" in kind:
        return 8 << 20, 48 << 20          # v7x: only 64 MiB physical VMEM
    return 8 << 20, 64 << 20              # v6e / default: plenty of headroom


def drop_path_forward(x, drop_prob=0.0, *, training=True, key=None, seed=0,
                      donate_x=False):
    """Pallas TPU DropPath forward matching the PyTorch module's semantics."""
    if (not training) or float(drop_prob) == 0.0:
        return x                                   # identity path of the module

    keep_prob = 1.0 - float(drop_prob)
    B = int(x.shape[0])
    M = 1
    for d in x.shape[1:]:
        M *= int(d)

    # One Bernoulli(keep_prob) draw per batch element, computed in the wrapper.
    if key is None:
        key = jax.random.PRNGKey(seed)
    u = jax.random.uniform(key, (B,), dtype=jnp.float32)
    scale = jnp.floor(keep_prob + u) * (1.0 / keep_prob)      # (B,): 0 or 1/kp
    scale3 = scale.reshape(B, 1, 1)

    itemsize = jnp.dtype(x.dtype).itemsize
    # Dtype-aware sublane count: 8 for 32-bit, 16 for bf16/f16, 32 for int8/fp8.
    native_rows = 8 * max(1, 4 // itemsize)
    if M % (native_rows * 128) == 0:
        rows, cols = native_rows, M // native_rows
    elif M % (8 * 128) == 0:
        rows, cols = 8, M // 8
    elif M % 128 == 0:
        rows, cols = M // 128, 128
    else:
        rows, cols = 1, M                          # tiny / ragged fallback

    x3 = x.reshape(B, rows, cols)

    block_cap, vmem_limit = _vmem_budget()
    per_sample_bytes = rows * cols * itemsize

    if per_sample_bytes <= block_cap:
        # Whole sample per block; fuse several samples per block when small.
        tile_c = cols
        bt = max(1, min(B, block_cap // per_sample_bytes))
        while B % bt != 0:                         # keep batch blocks exact
            bt -= 1
    else:
        # Large sample: one sample per block, tile the lane (last) axis.
        bt = 1
        tile_c = max(128, (block_cap // (rows * itemsize)) // 128 * 128)

    grid = (B // bt, pl.cdiv(cols, tile_c))

    out = pl.pallas_call(
        _drop_path_kernel,
        out_shape=jax.ShapeDtypeStruct((B, rows, cols), x.dtype),
        grid=grid,
        in_specs=[
            pl.BlockSpec((bt, 1, 1), lambda b, t: (b, 0, 0)),
            pl.BlockSpec((bt, rows, tile_c), lambda b, t: (b, 0, t)),
        ],
        out_specs=pl.BlockSpec((bt, rows, tile_c), lambda b, t: (b, 0, t)),
        compiler_params=pltpu.CompilerParams(
            dimension_semantics=("parallel", "parallel"),
            vmem_limit_bytes=vmem_limit),
        cost_estimate=pl.CostEstimate(
            flops=B * M,
            transcendentals=0,
            bytes_accessed=2 * B * M * itemsize + B * 4),
        input_output_aliases=({1: 0} if donate_x else {}),
    )(scale3, x3)

    return out.reshape(x.shape)


if __name__ == "__main__":
    B, C, H, W = 2, 4, 16, 16
    drop_prob = 0.25
    keep_prob = 1.0 - drop_prob

    key = jax.random.PRNGKey(0)
    kx, kd = jax.random.split(key)
    x = jax.random.normal(kx, (B, C, H, W), dtype=jnp.float32)

    # Training path (randomized per-sample keep/drop, exercises the kernel).
    y = drop_path_forward(x, drop_prob, training=True, key=kd)
    y = jax.block_until_ready(y)
    assert y.shape == x.shape
    assert bool(jnp.all(jnp.isfinite(y)))

    # Exact reference: same wrapper-side Bernoulli draw, applied in pure JAX.
    u = jax.random.uniform(kd, (B,), dtype=jnp.float32)
    scale_ref = jnp.floor(keep_prob + u) / keep_prob
    y_ref = x * scale_ref.reshape(B, 1, 1, 1)
    assert bool(jnp.allclose(y, y_ref, rtol=1e-5, atol=1e-5))

    # Each batch element must be either fully zeroed (dropped path) or scaled
    # by exactly 1/keep_prob (kept path).
    for b in range(B):
        zero_ok = bool(jnp.allclose(y[b], 0.0))
        scaled_ok = bool(jnp.allclose(y[b], x[b] / keep_prob,
                                      rtol=1e-5, atol=1e-5))
        assert zero_ok or scaled_ok, f"batch {b}: not a valid DropPath output"

    # Identity paths (eval mode / drop_prob == 0) match the PyTorch module.
    assert bool(jnp.allclose(drop_path_forward(x, drop_prob, training=False), x))
    assert bool(jnp.allclose(drop_path_forward(x, 0.0, training=True), x))

    # bf16 + batch-fused path (small per-sample bytes, dtype-aware sublanes).
    xb = jax.random.normal(jax.random.PRNGKey(3), (4, 8, 8, 32),
                           dtype=jnp.bfloat16)
    kb = jax.random.PRNGKey(7)
    yb = jax.block_until_ready(drop_path_forward(xb, 0.5, training=True, key=kb))
    ub = jax.random.uniform(kb, (4,), dtype=jnp.float32)
    sb = (jnp.floor(0.5 + ub) / 0.5).astype(jnp.bfloat16)
    yb_ref = xb * sb.reshape(4, 1, 1, 1)
    assert bool(jnp.allclose(yb.astype(jnp.float32), yb_ref.astype(jnp.float32),
                             rtol=2e-2, atol=2e-2))

    print("KERNEL_OK")
</pallas_src>

<mosaic_0001>
module attributes {stable_mosaic.version = 11 : i64} {
  func.func @_drop_path_kernel(%arg0: i32, %arg1: i32, %arg2: memref<2x1x1xf32, #tpu.memory_space<vmem>>, %arg3: memref<2x8x128xf32, #tpu.memory_space<vmem>>, %arg4: memref<2x8x128xf32, #tpu.memory_space<vmem>>) attributes {dimension_semantics = [#tpu.dimension_semantics<parallel>, #tpu.dimension_semantics<parallel>], iteration_bounds = array<i64: 1, 1>, scalar_prefetch = 0 : i64, scratch_operands = 0 : i64, tpu.core_type = #tpu.core_type<tc>, window_params = [{transform_indices = @transform_0, window_bounds = array<i64: 2, 1, 1>}, {transform_indices = @transform_1, window_bounds = array<i64: 2, 8, 128>}, {transform_indices = @transform_2, window_bounds = array<i64: 2, 8, 128>}]} {
    %c0 = arith.constant 0 : index
    %c0_0 = arith.constant 0 : index
    %c0_1 = arith.constant 0 : index
    %0 = vector.load %arg2[%c0, %c0_0, %c0_1] : memref<2x1x1xf32, #tpu.memory_space<vmem>>, vector<2x1x1xf32>
    %c0_2 = arith.constant 0 : index
    %c0_3 = arith.constant 0 : index
    %c0_4 = arith.constant 0 : index
    %1 = vector.load %arg3[%c0_2, %c0_3, %c0_4] : memref<2x8x128xf32, #tpu.memory_space<vmem>>, vector<2x8x128xf32>
    %2 = vector.broadcast %0 : vector<2x1x1xf32> to vector<2x8x128xf32>
    %3 = arith.mulf %1, %2 : vector<2x8x128xf32>
    %c0_5 = arith.constant 0 : index
    %c0_6 = arith.constant 0 : index
    %c0_7 = arith.constant 0 : index
    %4 = vector.load %arg4[%c0_5, %c0_6, %c0_7] : memref<2x8x128xf32, #tpu.memory_space<vmem>>, vector<2x8x128xf32>
    tpu.vector_store %arg4[%c0_5, %c0_6, %c0_7], %3 {strides = array<i32>} : memref<2x8x128xf32, #tpu.memory_space<vmem>>, vector<2x8x128xf32>,
    return
  }
  func.func @transform_0(%arg0: i32, %arg1: i32) -> (i32, i32, i32) {
    %c0_i32 = arith.constant 0 : i32
    %c0_i32_0 = arith.constant 0 : i32
    %c0_i32_1 = arith.constant 0 : i32
    return %arg0, %c0_i32, %c0_i32_0 : i32, i32, i32
  }
  func.func @transform_1(%arg0: i32, %arg1: i32) -> (i32, i32, i32) {
    %c0_i32 = arith.constant 0 : i32
    %c0_i32_0 = arith.constant 0 : i32
    return %arg0, %c0_i32, %arg1 : i32, i32, i32
  }
  func.func @transform_2(%arg0: i32, %arg1: i32) -> (i32, i32, i32) {
    %c0_i32 = arith.constant 0 : i32
    %c0_i32_0 = arith.constant 0 : i32
    return %arg0, %c0_i32, %arg1 : i32, i32, i32
  }
}

</mosaic_0001>

<bundles_post_ra>
// kernel: tpu_custom_call.1
= control target key start
LH: loop header
LB: loop body
LE: loop exit
PB: predicated region body
PF: predicated region fallthrough
CT: control target
= control target key end

     0   :  { %7 = vsyncpa [#allocation3], 0  ;;  %s159_s0 = inlined_call_operand.vmem [shape: f32[2,1,1], index: 0, kind: input, shape index: {}]   ;;  %s160_s1 = inlined_call_operand.hbm [shape: f32[2,8,128], index: 1, kind: input, shape index: {}]   ;;  %s161_s2 = inlined_call_operand.hbm [shape: f32[2,8,128], index: 2, kind: output, shape index: {}]  }
   0x1   :  { %8 = vsyncpa [#allocation4], 0  ;;  %s15_s11 = sshll.u32 %s160_s1, 4  ;;  %s127_s12 = smov [#allocation2]   ;;  %s16_s11 = int_to_ptr.hbm [resolvable:$true] %s15_s11 }
   0x2   :  { %s17_s13 = sshll.u32 %s127_s12, 4  ;;  %s128_s14 = smov 128   ;;  %s18_s13 = int_to_ptr.vmem [resolvable:$true] %s17_s13 }
   0x3   :  { %s129_s15 = smov 8  }
   0x4   :  { %23 = dma.hbm_to_vmem [thread:$0]  %s16_s11, 256, %s18_s13, [#allocation3], %s128_s14, %s128_s14, %s129_s15  }
   0x5   :  { %123 = dma.done.wait [#allocation3], 256  }
   0x6   :  { %124 = vsyncadd [#allocation3], 4294967040  ;;  %v130_v0 = vmov 0   ;;  %v73_v1 = vld [vmem:[%s159_s0] ss:$0 sm:$0xff]  ;;  %v31_v6 = vld [vmem:[#allocation2 + $0x8] sm:$0xff] }
   0x7   :  { %72 = vset.pattern.permute.xlu0 %v130_v0  ;;  %v74_v2 = vld [vmem:[%s159_s0 + $0x1] ss:$0 sm:$0xff]  ;;  %s131_s1 = smov [#allocation5]   ;;  %s54_s23 = sshll.u32 %s161_s2, 4  ;;  %s55_s23 = int_to_ptr.hbm [resolvable:$true] %s54_s23 }
   0x8   :  { %37 = vperm.xlu0 %72, %v73_v1   ;;  %v30_v3 = vld [vmem:[#allocation2] sm:$0xff]  ;;  %s52_s20 = sshll.u32 %s131_s1, 4  ;;  %s53_s20 = int_to_ptr.vmem [resolvable:$true] %s52_s20 }
  0x10   :  { %41 = vperm.xlu0 %72, %v74_v2  }
  0x7a   :  { %v38_v4 = vpop.permute.xlu0 %37 }
  0x7b   :  { %v44_v5 = vmul.f32 %v38_v4, %v30_v3 }
  0x7d   :  { %46 = vst [vmem:[#allocation5] sm:$0xff] %v44_v5 }
  0x82   :  { %v42_v7 = vpop.permute.xlu0 %41 }
  0x83   :  { %v45_v8 = vmul.f32 %v42_v7, %v31_v6 }
  0x85   :  { %47 = vst [vmem:[#allocation5 + $0x8] sm:$0xff] %v45_v8 }
  0x86   :  { %60 = dma.vmem_to_hbm [thread:$0]  %s53_s20, 256, %s55_s23, [#allocation4], %s128_s14, %s128_s14, %s129_s15  }
  0x87   :  { %125 = dma.done.wait [#allocation4], 256  }
  0x88   :  { %126 = vsyncadd [#allocation4], 4294967040 }
  0x89   :  { %65 = vsyncpa [#allocation3], 1 }
  0x8a   :  { %66 = vsyncpa [#allocation4], 1 }

</bundles_post_ra>
